<compile_context>
chip_gen: v6e
topology: v6e:2x2x1
jax: 0.10.0
libtpu: 0.0.40
codegen_flags: <defaults>
</compile_context>

<pallas_src>
import math
from functools import partial

import jax
import jax.numpy as jnp
from jax import lax
from jax.experimental import pallas as pl
from jax.experimental.pallas import tpu as pltpu

_LANES = 128
_SUBLANES = 8
_MAX_BLOCK_ROWS = 1024        # (1024, 128) f32 tile = 512 KiB per grid step
_NUM_SPLITS = 2               # megacore split (v7x); harmless on v5e/v6e


# ----------------------------------------------------------------------------
# Pallas kernel: stream tiles, fold into per-split (8,128) vector accumulators.
# ----------------------------------------------------------------------------
def _obs_kernel(x_ref, max_ref, sum_ref, sq_ref, cnt_ref, *,
                br, steps, rows, need_mask):
    p = pl.program_id(0)          # parallel split (megacore)
    i = pl.program_id(1)          # reduction step within the split

    # Zero is the identity for max-of-|x|, sum, sum-of-squares and the count,
    # so we init once and then accumulate unconditionally (single code path).
    @pl.when(i == 0)
    def _init():
        max_ref[...] = jnp.zeros_like(max_ref)
        sum_ref[...] = jnp.zeros_like(sum_ref)
        sq_ref[...] = jnp.zeros_like(sq_ref)
        cnt_ref[...] = jnp.zeros_like(cnt_ref)

    y = jnp.abs(x_ref[...].astype(jnp.float32))          # (br, 128)

    if need_mask:  # static: only emitted when the last tile is ragged
        row0 = (p * steps + i) * br
        ridx = row0 + lax.broadcasted_iota(jnp.int32, (br, _LANES), 0)
        y = jnp.where(ridx < rows, y, 0.0)                # zero is stats-neutral

    # Fold (br,128) -> (8,128) with element-wise VPU ops (leading-axis reduce
    # stays inside vreg columns; no XLU cross-lane work per step).
    yt = y.reshape(br // _SUBLANES, _SUBLANES, _LANES)
    max_ref[...] = jnp.maximum(max_ref[...], jnp.max(yt, axis=0))
    sum_ref[...] = sum_ref[...] + jnp.sum(yt, axis=0)
    sq_ref[...] = sq_ref[...] + jnp.sum(yt * yt, axis=0)
    cnt_ref[...] = cnt_ref[...] + jnp.sum(
        jnp.where(yt != 0.0, 1.0, 0.0), axis=0)


def observer_stats(x):
    """Returns (max|x|, sum|x|, sum x^2, #nonzero) as f32 scalars via Pallas."""
    flat = jnp.ravel(x)                       # no astype: cast happens in-kernel
    n = flat.shape[0]
    chunk = _SUBLANES * _LANES
    n_pad = pl.cdiv(n, chunk) * chunk
    if n_pad != n:                            # rare: pad only when ragged
        flat = jnp.pad(flat, (0, n_pad - n))  # zeros are stats-neutral
    rows = n_pad // _LANES
    slab = flat.reshape(rows, _LANES)

    br = min(_MAX_BLOCK_ROWS, rows)           # rows is a multiple of 8, so is br
    blocks = pl.cdiv(rows, br)
    splits = _NUM_SPLITS if (blocks % _NUM_SPLITS == 0) else 1
    steps = blocks // splits
    need_mask = (rows % br) != 0              # partial last tile -> garbage rows

    kernel = partial(_obs_kernel, br=br, steps=steps, rows=rows,
                     need_mask=need_mask)

    part = jax.ShapeDtypeStruct((splits * _SUBLANES, _LANES), jnp.float32)
    out_spec = pl.BlockSpec((_SUBLANES, _LANES), lambda p, i: (p, 0))

    pmax, psum, psq, pcnt = pl.pallas_call(
        kernel,
        out_shape=(part, part, part, part),
        grid_spec=pltpu.PrefetchScalarGridSpec(
            num_scalar_prefetch=0,
            grid=(splits, steps),
            in_specs=[pl.BlockSpec((br, _LANES), lambda p, i: (p * steps + i, 0))],
            out_specs=(out_spec, out_spec, out_spec, out_spec),
        ),
        compiler_params=pltpu.CompilerParams(
            dimension_semantics=("parallel", "arbitrary")),
    )(slab)

    # Final cross-lane reduction on tiny (splits*8, 128) partials (XLA side).
    return (jnp.max(pmax), jnp.sum(psum), jnp.sum(psq), jnp.sum(pcnt))


# ----------------------------------------------------------------------------
# get_scale_func equivalents, driven by the kernel-computed statistics.
# ----------------------------------------------------------------------------
def scale_from_stats(mode, Qp, stats):
    mx, sm, sq, cnt = stats
    if mode == 'minmax':
        return mx / Qp
    mean = sm / cnt
    if mode == 'lsq':
        return 2.0 * mean / math.sqrt(Qp)
    if mode == 'lsq+':
        # torch.std_mean uses the unbiased (N-1) estimator.
        var = (sq - cnt * mean * mean) / (cnt - 1.0)
        std = jnp.sqrt(jnp.maximum(var, 0.0))
        return jnp.maximum(jnp.abs(mean - 3.0 * std),
                           jnp.abs(mean + 3.0 * std)) / Qp
    raise NotImplementedError(mode)


@partial(jax.jit, static_argnames=("mode", "Qp"))
def _calibrate(x, *, mode, Qp):
    return scale_from_stats(mode, Qp, observer_stats(x))


def grad_scale(x, scale):
    # forward value == x; gradient w.r.t. x is scaled by `scale`.
    y_grad = x * scale
    return lax.stop_gradient(x) - lax.stop_gradient(y_grad) + y_grad


class LSQObserver:
    """JAX/Pallas port of the PyTorch LSQObserver (state kept Python-side)."""

    def __init__(self, mode, Qn, Qp, calibrate_count=1, momentum=0.1):
        self.mode = mode
        self.Qn = Qn
        self.Qp = Qp
        self.momentum = momentum
        self.scale = jnp.float32(0.0)     # Parameter(torch.tensor(0.0))
        self.g = None
        self.calibrate_count = calibrate_count
        self.counter = 0

    def init_scale_counter(self):
        self.counter = 0

    def get_scale(self):
        return self.scale

    def forward(self, x):
        if self.counter < self.calibrate_count:
            obs = _calibrate(x, mode=self.mode, Qp=self.Qp)
            if self.counter == 0:
                self.scale = obs
                # (PyTorch prints prev/cur here; omitted to keep stdout clean)
            else:
                self.scale = ((1.0 - self.momentum) * self.scale
                              + self.momentum * obs)
            self.counter += 1
        if self.g is None:
            self.g = 1.0 / math.sqrt(x.size * self.Qp)
        return grad_scale(self.scale, self.g)

    __call__ = forward


# ----------------------------------------------------------------------------
# Pure-JAX reference (mirrors the PyTorch observer exactly) for verification.
# ----------------------------------------------------------------------------
def _ref_observer_scale(mode, Qp, x):
    y = jnp.abs(jnp.asarray(x, jnp.float32))
    if mode == 'minmax':
        return jnp.max(y) / Qp
    nz = y[y != 0]                      # eager boolean indexing (not jitted)
    if mode == 'lsq':
        return 2.0 * jnp.mean(nz) / math.sqrt(Qp)
    if mode == 'lsq+':
        mean = jnp.mean(nz)
        std = jnp.std(nz, ddof=1)
        return jnp.maximum(jnp.abs(mean - 3.0 * std),
                           jnp.abs(mean + 3.0 * std)) / Qp
    raise NotImplementedError(mode)


if __name__ == "__main__":
    key = jax.random.PRNGKey(0)
    x = jax.random.normal(key, (2, 4, 16, 16), dtype=jnp.float32)  # NCHW

    Qn, Qp = -128, 127

    for mode in ('minmax', 'lsq', 'lsq+'):
        obs = LSQObserver(mode, Qn, Qp, calibrate_count=2, momentum=0.1)
        s1 = obs(x)                        # counter 0 -> direct assign
        s2 = obs(x)                        # counter 1 -> EMA (same x => same value)
        s3 = obs(x)                        # calibration done -> stored scale
        jax.block_until_ready((s1, s2, s3))

        ref = _ref_observer_scale(mode, Qp, x)
        for got in (s1, s2, s3):
            assert jnp.allclose(got, ref, rtol=1e-3, atol=1e-6), (
                f"mode={mode}: kernel scale {got} vs reference {ref}")
        assert s1.shape == () and s1.dtype == jnp.float32

    # Larger, ragged-sized tensor: exercises multi-tile grid + in-kernel mask.
    xbig = jax.random.normal(jax.random.PRNGKey(1), (3, 7, 33, 65),
                             dtype=jnp.float32)
    obs_big = LSQObserver('lsq+', Qn, Qp, calibrate_count=1)
    sb = obs_big(xbig)
    jax.block_until_ready(sb)
    refb = _ref_observer_scale('lsq+', Qp, xbig)
    assert jnp.allclose(sb, refb, rtol=1e-3, atol=1e-6), (sb, refb)

    print("KERNEL_OK")
</pallas_src>

<mosaic_0001>
module attributes {stable_mosaic.version = 11 : i64} {
  func.func @_obs_kernel(%arg0: i32, %arg1: i32, %arg2: memref<16x128xf32, #tpu.memory_space<vmem>>, %arg3: memref<8x128xf32, #tpu.memory_space<vmem>>, %arg4: memref<8x128xf32, #tpu.memory_space<vmem>>, %arg5: memref<8x128xf32, #tpu.memory_space<vmem>>, %arg6: memref<8x128xf32, #tpu.memory_space<vmem>>) attributes {dimension_semantics = [#tpu.dimension_semantics<parallel>, #tpu.dimension_semantics<arbitrary>], iteration_bounds = array<i64: 1, 1>, scalar_prefetch = 0 : i64, scratch_operands = 0 : i64, tpu.core_type = #tpu.core_type<tc>, window_params = [{transform_indices = @transform_0, window_bounds = array<i64: 16, 128>}, {transform_indices = @transform_1, window_bounds = array<i64: 8, 128>}, {transform_indices = @transform_2, window_bounds = array<i64: 8, 128>}, {transform_indices = @transform_3, window_bounds = array<i64: 8, 128>}, {transform_indices = @transform_4, window_bounds = array<i64: 8, 128>}]} {
    %c0_i32 = arith.constant 0 : i32
    %0 = arith.cmpi eq, %arg1, %c0_i32 : i32
    %1 = arith.extui %0 : i1 to i32
    %c0_i32_0 = arith.constant 0 : i32
    %2 = arith.cmpi ne, %1, %c0_i32_0 : i32
    scf.if %2 {
      %cst_24 = arith.constant 0.000000e+00 : f32
      %28 = vector.broadcast %cst_24 : f32 to vector<8x128xf32>
      %c0_25 = arith.constant 0 : index
      %c0_26 = arith.constant 0 : index
      %29 = vector.load %arg3[%c0_25, %c0_26] : memref<8x128xf32, #tpu.memory_space<vmem>>, vector<8x128xf32>
      tpu.vector_store %arg3[%c0_25, %c0_26], %28 {strides = array<i32>} : memref<8x128xf32, #tpu.memory_space<vmem>>, vector<8x128xf32>,
      %cst_27 = arith.constant 0.000000e+00 : f32
      %30 = vector.broadcast %cst_27 : f32 to vector<8x128xf32>
      %c0_28 = arith.constant 0 : index
      %c0_29 = arith.constant 0 : index
      %31 = vector.load %arg4[%c0_28, %c0_29] : memref<8x128xf32, #tpu.memory_space<vmem>>, vector<8x128xf32>
      tpu.vector_store %arg4[%c0_28, %c0_29], %30 {strides = array<i32>} : memref<8x128xf32, #tpu.memory_space<vmem>>, vector<8x128xf32>,
      %cst_30 = arith.constant 0.000000e+00 : f32
      %32 = vector.broadcast %cst_30 : f32 to vector<8x128xf32>
      %c0_31 = arith.constant 0 : index
      %c0_32 = arith.constant 0 : index
      %33 = vector.load %arg5[%c0_31, %c0_32] : memref<8x128xf32, #tpu.memory_space<vmem>>, vector<8x128xf32>
      tpu.vector_store %arg5[%c0_31, %c0_32], %32 {strides = array<i32>} : memref<8x128xf32, #tpu.memory_space<vmem>>, vector<8x128xf32>,
      %cst_33 = arith.constant 0.000000e+00 : f32
      %34 = vector.broadcast %cst_33 : f32 to vector<8x128xf32>
      %c0_34 = arith.constant 0 : index
      %c0_35 = arith.constant 0 : index
      %35 = vector.load %arg6[%c0_34, %c0_35] : memref<8x128xf32, #tpu.memory_space<vmem>>, vector<8x128xf32>
      tpu.vector_store %arg6[%c0_34, %c0_35], %34 {strides = array<i32>} : memref<8x128xf32, #tpu.memory_space<vmem>>, vector<8x128xf32>,
    } else {
    }
    %c0 = arith.constant 0 : index
    %c0_1 = arith.constant 0 : index
    %3 = vector.load %arg2[%c0, %c0_1] : memref<16x128xf32, #tpu.memory_space<vmem>>, vector<16x128xf32>
    %4 = math.absf %3 : vector<16x128xf32>
    %5 = vector.shape_cast %4 : vector<16x128xf32> to vector<2x8x128xf32>
    %c0_2 = arith.constant 0 : index
    %c0_3 = arith.constant 0 : index
    %6 = vector.load %arg3[%c0_2, %c0_3] : memref<8x128xf32, #tpu.memory_space<vmem>>, vector<8x128xf32>
    %cst = arith.constant dense<0xFF800000> : vector<8x128xf32>
    %7 = vector.multi_reduction <maximumf>, %5, %cst [0] : vector<2x8x128xf32> to vector<8x128xf32>
    %8 = arith.maximumf %6, %7 : vector<8x128xf32>
    %c0_4 = arith.constant 0 : index
    %c0_5 = arith.constant 0 : index
    %9 = vector.load %arg3[%c0_4, %c0_5] : memref<8x128xf32, #tpu.memory_space<vmem>>, vector<8x128xf32>
    tpu.vector_store %arg3[%c0_4, %c0_5], %8 {strides = array<i32>} : memref<8x128xf32, #tpu.memory_space<vmem>>, vector<8x128xf32>,
    %c0_6 = arith.constant 0 : index
    %c0_7 = arith.constant 0 : index
    %10 = vector.load %arg4[%c0_6, %c0_7] : memref<8x128xf32, #tpu.memory_space<vmem>>, vector<8x128xf32>
    %cst_8 = arith.constant dense<0.000000e+00> : vector<8x128xf32>
    %11 = vector.multi_reduction <add>, %5, %cst_8 [0] : vector<2x8x128xf32> to vector<8x128xf32>
    %12 = arith.addf %10, %11 : vector<8x128xf32>
    %c0_9 = arith.constant 0 : index
    %c0_10 = arith.constant 0 : index
    %13 = vector.load %arg4[%c0_9, %c0_10] : memref<8x128xf32, #tpu.memory_space<vmem>>, vector<8x128xf32>
    tpu.vector_store %arg4[%c0_9, %c0_10], %12 {strides = array<i32>} : memref<8x128xf32, #tpu.memory_space<vmem>>, vector<8x128xf32>,
    %c0_11 = arith.constant 0 : index
    %c0_12 = arith.constant 0 : index
    %14 = vector.load %arg5[%c0_11, %c0_12] : memref<8x128xf32, #tpu.memory_space<vmem>>, vector<8x128xf32>
    %15 = arith.mulf %5, %5 : vector<2x8x128xf32>
    %cst_13 = arith.constant dense<0.000000e+00> : vector<8x128xf32>
    %16 = vector.multi_reduction <add>, %15, %cst_13 [0] : vector<2x8x128xf32> to vector<8x128xf32>
    %17 = arith.addf %14, %16 : vector<8x128xf32>
    %c0_14 = arith.constant 0 : index
    %c0_15 = arith.constant 0 : index
    %18 = vector.load %arg5[%c0_14, %c0_15] : memref<8x128xf32, #tpu.memory_space<vmem>>, vector<8x128xf32>
    tpu.vector_store %arg5[%c0_14, %c0_15], %17 {strides = array<i32>} : memref<8x128xf32, #tpu.memory_space<vmem>>, vector<8x128xf32>,
    %c0_16 = arith.constant 0 : index
    %c0_17 = arith.constant 0 : index
    %19 = vector.load %arg6[%c0_16, %c0_17] : memref<8x128xf32, #tpu.memory_space<vmem>>, vector<8x128xf32>
    %cst_18 = arith.constant 0.000000e+00 : f32
    %20 = vector.broadcast %cst_18 : f32 to vector<2x8x128xf32>
    %21 = arith.cmpf one, %5, %20 : vector<2x8x128xf32>
    %cst_19 = arith.constant 1.000000e+00 : f32
    %cst_20 = arith.constant 0.000000e+00 : f32
    %22 = vector.broadcast %cst_19 : f32 to vector<2x8x128xf32>
    %23 = vector.broadcast %cst_20 : f32 to vector<2x8x128xf32>
    %24 = arith.select %21, %22, %23 : vector<2x8x128xi1>, vector<2x8x128xf32>
    %cst_21 = arith.constant dense<0.000000e+00> : vector<8x128xf32>
    %25 = vector.multi_reduction <add>, %24, %cst_21 [0] : vector<2x8x128xf32> to vector<8x128xf32>
    %26 = arith.addf %19, %25 : vector<8x128xf32>
    %c0_22 = arith.constant 0 : index
    %c0_23 = arith.constant 0 : index
    %27 = vector.load %arg6[%c0_22, %c0_23] : memref<8x128xf32, #tpu.memory_space<vmem>>, vector<8x128xf32>
    tpu.vector_store %arg6[%c0_22, %c0_23], %26 {strides = array<i32>} : memref<8x128xf32, #tpu.memory_space<vmem>>, vector<8x128xf32>,
    return
  }
  func.func @transform_0(%arg0: i32, %arg1: i32) -> (i32, i32) {
    %c1_i32 = arith.constant 1 : i32
    %0 = arith.muli %arg0, %c1_i32 : i32
    %1 = arith.addi %0, %arg1 : i32
    %c0_i32 = arith.constant 0 : i32
    %c0_i32_0 = arith.constant 0 : i32
    return %1, %c0_i32 : i32, i32
  }
  func.func @transform_1(%arg0: i32, %arg1: i32) -> (i32, i32) {
    %c0_i32 = arith.constant 0 : i32
    %c0_i32_0 = arith.constant 0 : i32
    return %arg0, %c0_i32 : i32, i32
  }
  func.func @transform_2(%arg0: i32, %arg1: i32) -> (i32, i32) {
    %c0_i32 = arith.constant 0 : i32
    %c0_i32_0 = arith.constant 0 : i32
    return %arg0, %c0_i32 : i32, i32
  }
  func.func @transform_3(%arg0: i32, %arg1: i32) -> (i32, i32) {
    %c0_i32 = arith.constant 0 : i32
    %c0_i32_0 = arith.constant 0 : i32
    return %arg0, %c0_i32 : i32, i32
  }
  func.func @transform_4(%arg0: i32, %arg1: i32) -> (i32, i32) {
    %c0_i32 = arith.constant 0 : i32
    %c0_i32_0 = arith.constant 0 : i32
    return %arg0, %c0_i32 : i32, i32
  }
}

</mosaic_0001>

<bundles_post_ra>
// kernel: _calibrate.1
= control target key start
LH: loop header
LB: loop body
LE: loop exit
PB: predicated region body
PF: predicated region fallthrough
CT: control target
= control target key end

     0   :  { %10 = vsyncpa [#allocation3], 0  ;;  %s236_s0 = inlined_call_operand.vmem [shape: f32[16,128], index: 0, kind: input, shape index: {}]   ;;  %s237_s1 = inlined_call_operand.vmem [shape: f32[8,128], index: 1, kind: output, shape index: {0}]   ;;  %s238_s2 = inlined_call_operand.hbm [shape: f32[8,128], index: 2, kind: output, shape index: {1}]   ;;  %s239_s3 = inlined_call_operand.hbm [shape: f32[8,128], index: 3, kind: output, shape index: {2}]   ;;  %s240_s4 = inlined_call_operand.hbm [shape: f32[8,128], index: 4, kind: output, shape index: {3}]  }
   0x1   :  { %v44_v0 = vld [vmem:[%s236_s0] sm:$0xff]  ;;  %v45_v1 = vld [vmem:[%s236_s0 + $0x8] sm:$0xff] }
   0x2   :  { %11 = vsyncpa [#allocation5], 0  ;;  %v46_v2 = vand.u32 2147483647, %v44_v0  ;;  %v47_v3 = vand.u32 2147483647, %v45_v1 }
   0x3   :  { %s189_s19 = smov [#allocation2]   ;;  %v190_v7 = vmov 0.0   ;;  %s191_s21 = smov [#allocation4]  }
   0x4   :  { %s78_s20 = sshll.u32 %s189_s19, 4  ;;  %v57_v4 = vmul.f32 %v46_v2, %v46_v2  ;;  %v58_v5 = vmul.f32 %v47_v3, %v47_v3  ;;  %v53_v6 = vadd.f32 %v47_v3, %v46_v2  ;;  %vm63_vm0 = vcmp.ne.f32.partialorder %v46_v2, 0.0  ;;  %s88_s22 = sshll.u32 %s191_s21, 4  ;;  %s79_s20 = int_to_ptr.vmem [resolvable:$true] %s78_s20  ;;  %s89_s22 = int_to_ptr.vmem [resolvable:$true] %s88_s22 }
   0x5   :  { %vm64_vm1 = vcmp.ne.f32.partialorder %v47_v3, 0.0  ;;  %v65_v8 = vsel %vm63_vm0, 1.0, %v190_v7  ;;  %v49_v9 = vmax.f32 %v46_v2, %v47_v3  ;;  %s192_s23 = smov [#allocation6]   ;;  %s125_s26 = scalar_lea.vmem %s79_s20, 128 }
   0x6   :  { %s98_s24 = sshll.u32 %s192_s23, 4  ;;  %v59_v10 = vadd.f32 %v58_v5, %v57_v4  ;;  %v66_v11 = vsel %vm64_vm1, 1.0, %v190_v7  ;;  %55 = vst [vmem:[#allocation2] sm:$0xff] %v53_v6  ;;  %p126_p0 = scmp.ne.s32.totalorder %s79_s20, %s125_s26  ;;  %s99_s24 = int_to_ptr.vmem [resolvable:$true] %s98_s24 }
   0x7   :  { %v67_v12 = vadd.f32 %v66_v11, %v65_v8  ;;  %v50_v13 = vmax.f32 %v49_v9, 0.0  ;;  %p130_p1 = scmp.lt.s32.totalorder %s79_s20, %s79_s20  ;;  %p131_p2 = scmp.lt.s32.totalorder %s125_s26, %s125_s26 }
   0x9   :  { %51 = vst [vmem:[%s237_s1] sm:$0xff] %v50_v13  ;;  %p132_p3 = por %p131_p2, %p130_p1 }
   0xb   :  { %p133_p4 = pnand %p132_p3, %p126_p0 }
   0xd   :  { %136 = shalt.err (!%p133_p4)
}
   0xe   :  { %81 = dma.vmem_to_hbm [thread:$0]  %s79_s20, 128, %s238_s2, [#allocation3]   ;;  %61 = vst [vmem:[#allocation4] sm:$0xff] %v59_v10  ;;  %69 = vst [vmem:[#allocation6] sm:$0xff] %v67_v12 }
   0xf   :  { %s145_s29 = scalar_lea.vmem %s89_s22, 128  ;;  %p150_p6 = scmp.lt.s32.totalorder %s89_s22, %s89_s22 }
  0x10   :  { %p146_p5 = scmp.ne.s32.totalorder %s89_s22, %s145_s29  ;;  %p151_p7 = scmp.lt.s32.totalorder %s145_s29, %s145_s29 }
  0x12   :  { %p152_p8 = por %p151_p7, %p150_p6 }
  0x14   :  { %p153_p9 = pnand %p152_p8, %p146_p5 }
  0x16   :  { %156 = shalt.err (!%p153_p9)
}
  0x17   :  { %91 = dma.vmem_to_hbm [thread:$0]  %s89_s22, 128, %s239_s3, [#allocation5]  }
  0x18   :  { %s165_s5 = scalar_lea.vmem %s99_s24, 128  ;;  %p170_p11 = scmp.lt.s32.totalorder %s99_s24, %s99_s24 }
  0x19   :  { %p166_p10 = scmp.ne.s32.totalorder %s99_s24, %s165_s5  ;;  %p171_p12 = scmp.lt.s32.totalorder %s165_s5, %s165_s5 }
  0x1b   :  { %p172_p13 = por %p171_p12, %p170_p11 }
  0x1d   :  { %p173_p0 = pnand %p172_p13, %p166_p10 }
  0x1f   :  { %176 = shalt.err (!%p173_p0)
}
  0x20   :  { %101 = dma.vmem_to_hbm [thread:$0]  %s99_s24, 128, %s240_s4, [#allocation5]  }
  0x21   :  { %185 = dma.done.wait [#allocation3], 128  }
  0x22   :  { %186 = vsyncadd [#allocation3], 4294967168 }
  0x23   :  { %187 = dma.done.wait [#allocation5], 256  }
  0x24   :  { %188 = vsyncadd [#allocation5], 4294967040 }
  0x25   :  { %113 = vsyncpa [#allocation3], 1 }
  0x26   :  { %114 = vsyncpa [#allocation5], 1 }

</bundles_post_ra>
